<compile_context>
chip_gen: v7x
topology: tpu7x:2x2x1
jax: 0.10.0
libtpu: 0.0.40
codegen_flags: <defaults>
</compile_context>

<pallas_src>
from functools import partial

import jax
import jax.numpy as jnp
from jax.experimental import pallas as pl
from jax.experimental.pallas import tpu as pltpu


def _round_up(v, m):
    return ((v + m - 1) // m) * m


def _pick_tile(dim_pad, desired, align):
    """Largest multiple of `align` that divides dim_pad and is <= desired."""
    best = align
    t = align
    limit = min(desired, dim_pad)
    while t <= limit:
        if dim_pad % t == 0:
            best = t
        t += align
    return best


# ---------------------------------------------------------------------------
# Streaming path: 1-D grid over batch, weight + bias resident in VMEM.
# ---------------------------------------------------------------------------
def _sbert_stream_kernel(x_ref, w_ref, b_ref, o_ref):
    # x_ref: (tm, D_pad) feed dtype; w_ref: (L_pad, D_pad) feed dtype (torch
    # layout, contraction on dim 1 of both -> no transpose materialized).
    # b_ref: (1, L_pad) f32; o_ref: (tm, L_pad) f32.
    y = jax.lax.dot_general(
        x_ref[...],
        w_ref[...],
        dimension_numbers=(((1,), (1,)), ((), ())),
        preferred_element_type=jnp.float32,
    )
    o_ref[...] = jnp.maximum(y + b_ref[...], 0.0).astype(o_ref.dtype)


def _sbert_forward_stream(x_p, w_p, b_p, tm):
    B_pad, D_pad = x_p.shape
    L_pad = w_p.shape[0]
    grid = (B_pad // tm,)
    return pl.pallas_call(
        _sbert_stream_kernel,
        out_shape=jax.ShapeDtypeStruct((B_pad, L_pad), jnp.float32),
        grid_spec=pltpu.PrefetchScalarGridSpec(
            num_scalar_prefetch=0,
            grid=grid,
            in_specs=[
                pl.BlockSpec((tm, D_pad), lambda i: (i, 0)),
                # Constant index_map: whole weight DMA'd once, stays resident.
                pl.BlockSpec((L_pad, D_pad), lambda i: (0, 0)),
                pl.BlockSpec((1, L_pad), lambda i: (0, 0)),
            ],
            out_specs=pl.BlockSpec((tm, L_pad), lambda i: (i, 0)),
        ),
        compiler_params=pltpu.CompilerParams(
            dimension_semantics=("parallel",),
        ),
    )(x_p, w_p, b_p)


# ---------------------------------------------------------------------------
# Tiled path: (M, N, K) grid, accumulate directly into the resident f32
# output block; bias-init at k==0, relu-only epilogue at k==last.
# ---------------------------------------------------------------------------
def _sbert_tiled_kernel(x_ref, w_ref, b_ref, o_ref):
    k = pl.program_id(2)

    @pl.when(k == 0)
    def _():
        # Seed the accumulator with the bias so the epilogue is just relu.
        o_ref[...] = jnp.zeros(o_ref.shape, o_ref.dtype) + b_ref[...]

    o_ref[...] += jax.lax.dot_general(
        x_ref[...],
        w_ref[...],
        dimension_numbers=(((1,), (1,)), ((), ())),
        preferred_element_type=jnp.float32,
    )

    @pl.when(k == pl.num_programs(2) - 1)
    def _():
        o_ref[...] = jnp.maximum(o_ref[...], 0.0)


def _sbert_forward_tiled(x_p, w_p, b_p, tm, tn, tk):
    B_pad, D_pad = x_p.shape
    L_pad = w_p.shape[0]
    grid = (B_pad // tm, L_pad // tn, D_pad // tk)
    return pl.pallas_call(
        _sbert_tiled_kernel,
        out_shape=jax.ShapeDtypeStruct((B_pad, L_pad), jnp.float32),
        grid_spec=pltpu.PrefetchScalarGridSpec(
            num_scalar_prefetch=0,
            grid=grid,
            in_specs=[
                pl.BlockSpec((tm, tk), lambda i, j, k: (i, k)),
                # W kept in torch (L, D) layout; block over (N, K).
                pl.BlockSpec((tn, tk), lambda i, j, k: (j, k)),
                pl.BlockSpec((1, tn), lambda i, j, k: (0, j)),
            ],
            out_specs=pl.BlockSpec((tm, tn), lambda i, j, k: (i, j)),
        ),
        compiler_params=pltpu.CompilerParams(
            dimension_semantics=("parallel", "parallel", "arbitrary"),
        ),
    )(x_p, w_p, b_p)


# ---------------------------------------------------------------------------
# Public wrapper: relu(x @ W^T + b), W in torch.nn.Linear layout (L, D).
# jit'ed so pad / cast / slice fuse with the pallas_call.
# ---------------------------------------------------------------------------
_STREAM_VMEM_BUDGET = 12 * 1024 * 1024  # safe under v5e's 16 MiB scoped VMEM


@partial(jax.jit, static_argnames=("force_tiled", "mxu_dtype"))
def sbert_forward(x, weight, bias, *, force_tiled=False, mxu_dtype=jnp.bfloat16):
    B, D = x.shape
    L, D2 = weight.shape
    assert D == D2
    assert bias.shape == (L,)

    # Pad only to the (8, 128) layout grain; no padding to tile multiples.
    B_pad = _round_up(B, 8)
    D_pad = _round_up(D, 128)
    L_pad = _round_up(L, 128)

    feed_bytes = jnp.dtype(mxu_dtype).itemsize
    x_p = jnp.pad(x, ((0, B_pad - B), (0, D_pad - D))).astype(mxu_dtype)
    w_p = jnp.pad(weight, ((0, L_pad - L), (0, D_pad - D))).astype(mxu_dtype)
    b_p = jnp.pad(bias, (0, L_pad - L)).reshape(1, L_pad).astype(jnp.float32)

    # Streaming route if the resident weight + double-buffered x/out blocks
    # fit comfortably in scoped VMEM on every generation.
    tm = _pick_tile(B_pad, 512, 8)
    vmem_stream = (
        L_pad * D_pad * feed_bytes
        + L_pad * 4
        + 2 * tm * D_pad * feed_bytes
        + 2 * tm * L_pad * 4
    )

    if (not force_tiled) and vmem_stream <= _STREAM_VMEM_BUDGET:
        out_p = _sbert_forward_stream(x_p, w_p, b_p, tm)
    else:
        tmt = _pick_tile(B_pad, 512, 8)
        tnt = _pick_tile(L_pad, 512, 128)
        tkt = _pick_tile(D_pad, 512, 128)
        out_p = _sbert_forward_tiled(x_p, w_p, b_p, tmt, tnt, tkt)

    # Padded rows/cols are sliced off; slice + cast fuse under jit.
    return out_p[:B, :L].astype(x.dtype)


if __name__ == "__main__":
    # Small shapes consistent with the module: batch=8, input_dimension=32,
    # num_of_labels=8.
    B, D, L = 8, 32, 8

    key = jax.random.PRNGKey(0)
    kx, kw, kb = jax.random.split(key, 3)

    x = jax.random.normal(kx, (B, D), dtype=jnp.float32)
    bound = 1.0 / (D ** 0.5)
    weight = jax.random.uniform(kw, (L, D), minval=-bound, maxval=bound,
                                dtype=jnp.float32)
    bias = jax.random.uniform(kb, (L,), minval=-bound, maxval=bound,
                              dtype=jnp.float32)

    ref = jnp.maximum(
        jnp.dot(x, weight.T, precision=jax.lax.Precision.HIGHEST) + bias, 0.0)

    # Default fast path: bf16 MXU feed, f32 accumulate (not bit-exact).
    out = jax.block_until_ready(sbert_forward(x, weight, bias))
    assert out.shape == (B, L)
    assert jnp.allclose(out, ref, atol=5e-2, rtol=5e-2)

    # f32 MXU feed: matches nn.Linear to f32 precision.
    out_exact = jax.block_until_ready(
        sbert_forward(x, weight, bias, mxu_dtype=jnp.float32))
    assert jnp.allclose(out_exact, ref, atol=1e-4, rtol=1e-4)

    # Exercise the (M, N, K) accumulator-grid path at a larger shape; tiles
    # divide the (8,128)-padded dims exactly (384, 256, 384) -> no waste.
    B2, D2, L2 = 384, 384, 200
    kx2, kw2, kb2 = jax.random.split(jax.random.PRNGKey(1), 3)
    x2 = jax.random.normal(kx2, (B2, D2), dtype=jnp.float32)
    bound2 = 1.0 / (D2 ** 0.5)
    w2 = jax.random.uniform(kw2, (L2, D2), minval=-bound2, maxval=bound2,
                            dtype=jnp.float32)
    b2 = jax.random.uniform(kb2, (L2,), minval=-bound2, maxval=bound2,
                            dtype=jnp.float32)
    out2 = jax.block_until_ready(sbert_forward(x2, w2, b2, force_tiled=True))
    ref2 = jnp.maximum(
        jnp.dot(x2, w2.T, precision=jax.lax.Precision.HIGHEST) + b2, 0.0)
    assert out2.shape == (B2, L2)
    assert jnp.allclose(out2, ref2, atol=5e-2, rtol=5e-2)

    print("KERNEL_OK")
</pallas_src>

<mosaic_0001>
module attributes {stable_mosaic.version = 11 : i64} {
  func.func @_sbert_stream_kernel(%arg0: i32, %arg1: memref<8x128xbf16, #tpu.memory_space<vmem>>, %arg2: memref<128x128xbf16, #tpu.memory_space<vmem>>, %arg3: memref<1x128xf32, #tpu.memory_space<vmem>>, %arg4: memref<8x128xf32, #tpu.memory_space<vmem>>) attributes {dimension_semantics = [#tpu.dimension_semantics<parallel>], iteration_bounds = array<i64: 1>, scalar_prefetch = 0 : i64, scratch_operands = 0 : i64, tpu.core_type = #tpu.core_type<tc>, window_params = [{transform_indices = @transform_0, window_bounds = array<i64: 8, 128>}, {pipeline_mode = #tpu.pipeline_mode<synchronous>, transform_indices = @transform_1, window_bounds = array<i64: 128, 128>}, {pipeline_mode = #tpu.pipeline_mode<synchronous>, transform_indices = @transform_2, window_bounds = array<i64: 1, 128>}, {transform_indices = @transform_3, window_bounds = array<i64: 8, 128>}]} {
    %c0 = arith.constant 0 : index
    %c0_0 = arith.constant 0 : index
    %0 = vector.load %arg1[%c0, %c0_0] : memref<8x128xbf16, #tpu.memory_space<vmem>>, vector<8x128xbf16>
    %c0_1 = arith.constant 0 : index
    %c0_2 = arith.constant 0 : index
    %1 = vector.load %arg2[%c0_1, %c0_2] : memref<128x128xbf16, #tpu.memory_space<vmem>>, vector<128x128xbf16>
    %cst = arith.constant dense<0.000000e+00> : vector<8x128xf32>
    %2 = tpu.matmul %0, %1, %cst {dimension_numbers = #tpu.dot_dimension_numbers<[1], [1], [0], [0], [0, 0, 1, 0], [], []>} : vector<8x128xbf16>, vector<128x128xbf16>, vector<8x128xf32> -> vector<8x128xf32>
    %c0_3 = arith.constant 0 : index
    %c0_4 = arith.constant 0 : index
    %3 = vector.load %arg3[%c0_3, %c0_4] : memref<1x128xf32, #tpu.memory_space<vmem>>, vector<1x128xf32>
    %4 = vector.broadcast %3 : vector<1x128xf32> to vector<8x128xf32>
    %5 = arith.addf %2, %4 : vector<8x128xf32>
    %cst_5 = arith.constant 0.000000e+00 : f32
    %6 = vector.broadcast %cst_5 : f32 to vector<8x128xf32>
    %7 = arith.maximumf %5, %6 : vector<8x128xf32>
    %c0_6 = arith.constant 0 : index
    %c0_7 = arith.constant 0 : index
    %8 = vector.load %arg4[%c0_6, %c0_7] : memref<8x128xf32, #tpu.memory_space<vmem>>, vector<8x128xf32>
    tpu.vector_store %arg4[%c0_6, %c0_7], %7 {strides = array<i32>} : memref<8x128xf32, #tpu.memory_space<vmem>>, vector<8x128xf32>,
    return
  }
  func.func @transform_0(%arg0: i32) -> (i32, i32) {
    %c0_i32 = arith.constant 0 : i32
    %c0_i32_0 = arith.constant 0 : i32
    return %arg0, %c0_i32 : i32, i32
  }
  func.func @transform_1(%arg0: i32) -> (i32, i32) {
    %c0_i32 = arith.constant 0 : i32
    %c0_i32_0 = arith.constant 0 : i32
    %c0_i32_1 = arith.constant 0 : i32
    return %c0_i32, %c0_i32_0 : i32, i32
  }
  func.func @transform_2(%arg0: i32) -> (i32, i32) {
    %c0_i32 = arith.constant 0 : i32
    %c0_i32_0 = arith.constant 0 : i32
    %c0_i32_1 = arith.constant 0 : i32
    return %c0_i32, %c0_i32_0 : i32, i32
  }
  func.func @transform_3(%arg0: i32) -> (i32, i32) {
    %c0_i32 = arith.constant 0 : i32
    %c0_i32_0 = arith.constant 0 : i32
    return %arg0, %c0_i32 : i32, i32
  }
}

</mosaic_0001>

<bundles_post_ra>
// kernel: sbert_forward.1
= control target key start
LH: loop header
LB: loop body
LE: loop exit
PB: predicated region body
PF: predicated region fallthrough
CT: control target
= control target key end

     0   :  { %v217_v1 = vmov 0.0   ;;  %vm218_vm0 = vmmov 0   ;;  %s282_s0 = inlined_call_operand.vmem [shape: bf16[8,128], index: 0, kind: input, shape index: {}]   ;;  %s283_s1 = inlined_call_operand.vmem [shape: bf16[128,128], index: 1, kind: input, shape index: {}]   ;;  %s284_s2 = inlined_call_operand.vmem [shape: f32[1,128], index: 2, kind: input, shape index: {}]   ;;  %s285_s3 = inlined_call_operand.hbm [shape: f32[8,128], index: 3, kind: output, shape index: {}]  }
   0x1   :  { %v185_v0 = vld [vmem:[%s283_s1] sm:$0xff]   ;;  %162 = vmatprep.subr.bf16.mxu0 %v217_v1  ;;  %178 = vmatprep.mubr.msk.bf16.mxu0 %vm218_vm0, %v217_v1  ;;  %v186_v2 = vld [vmem:[%s283_s1 + $0x8] sm:$0xff]  }
   0x2   :  { %163 = vmatpush3.bf16.xpose.msra.mxu0 %v185_v0 }
   0x3   :  { %164 = vmatprep.subr.bf16.mxu0 %v217_v1 }
   0x4   :  { %8 = vsyncpa [#allocation3], 0  ;;  %v187_v3 = vld [vmem:[%s283_s1 + $0x10] sm:$0xff]   ;;  %v188_v4 = vld [vmem:[%s283_s1 + $0x18] sm:$0xff]   ;;  %s219_s5 = smov [#allocation2]  }
   0x5   :  { %v189_v5 = vld [vmem:[%s283_s1 + $0x20] sm:$0xff]   ;;  %v190_v6 = vld [vmem:[%s283_s1 + $0x28] sm:$0xff]   ;;  %v191_v7 = vld [vmem:[%s283_s1 + $0x30] sm:$0xff]   ;;  %s136_s6 = sshll.u32 %s219_s5, 4  ;;  %s137_s6 = int_to_ptr.vmem [resolvable:$true] %s136_s6 }
   0x6   :  { %v192_v8 = vld [vmem:[%s283_s1 + $0x38] sm:$0xff]   ;;  %v16_v9 = vld [vmem:[%s282_s0] sm:$0xf]  ;;  %s193_s1 = scalar_lea.vmem %s137_s6, 128  ;;  %p198_p1 = scmp.lt.s32.totalorder %s137_s6, %s137_s6 }
   0x7   :  { %v144_v10 = vld [vmem:[%s284_s2] ss:$0 sm:$0xff]  ;;  %p194_p0 = scmp.ne.s32.totalorder %s137_s6, %s193_s1  ;;  %p199_p2 = scmp.lt.s32.totalorder %s193_s1, %s193_s1 }
   0x9   :  { %p200_p3 = por %p199_p2, %p198_p1 }
   0xa   :  { %165 = vmatpush3.bf16.xpose.msra.mxu0 %v186_v2 }
   0xb   :  { %166 = vmatprep.subr.bf16.mxu0 %v217_v1  ;;  %p201_p4 = pnand %p200_p3, %p194_p0 }
  0x12   :  { %167 = vmatpush3.bf16.xpose.msra.mxu0 %v187_v3 }
  0x13   :  { %168 = vmatprep.subr.bf16.mxu0 %v217_v1 }
  0x1a   :  { %169 = vmatpush3.bf16.xpose.msra.mxu0 %v188_v4 }
  0x1b   :  { %170 = vmatprep.subr.bf16.mxu0 %v217_v1 }
  0x22   :  { %171 = vmatpush3.bf16.xpose.msra.mxu0 %v189_v5 }
  0x23   :  { %172 = vmatprep.subr.bf16.mxu0 %v217_v1 }
  0x2a   :  { %173 = vmatpush3.bf16.xpose.msra.mxu0 %v190_v6 }
  0x2b   :  { %174 = vmatprep.subr.bf16.mxu0 %v217_v1 }
  0x32   :  { %175 = vmatpush3.bf16.xpose.msra.mxu0 %v191_v7 }
  0x33   :  { %176 = vmatprep.subr.bf16.mxu0 %v217_v1 }
  0x3a   :  { %177 = vmatpush3.bf16.xpose.msra.mxu0 %v192_v8 }
  0x41   :  { %179 = vmatmul.mubr.bf16.vlgmr.msra.gmra.mrb[0].mxu0 %v16_v9 }
 0x114   :  { %v122_v11 = vpop.f32.mrb[0].mxu0 }
 0x115   :  { %v123_v12 = vadd.f32 %v144_v10, %v122_v11  ;;  %v180_v13 = vpop.f32.mrb[1].mxu0 }
 0x116   :  { %v125_v14 = vpop.f32.mrb[2].mxu0 }
 0x117   :  { %v128_v15 = vmax.f32 %v123_v12, 0.0  ;;  %v181_v16 = vpop.f32.mrb[3].mxu0 }
 0x119   :  { %129 = vst [vmem:[#allocation2] sm:$0xff] %v128_v15 }
 0x11a   :  { %204 = shalt.err (!%p201_p4)
}
 0x11b   :  { %s205_s2 = scalar_lea.hbm %s285_s3, 128 }
 0x11c   :  { %p206_p5 = scmp.ne.s32.totalorder %s285_s3, %s205_s2  ;;  %p209_p6 = scmp.lt.u32.totalorder %s205_s2, %s285_s3 }
 0x11e   :  { %p211_p7 = pnand %p209_p6, %p206_p5 }
 0x120   :  { %214 = shalt.err (!%p211_p7)
}
 0x121   :  { %139 = dma.vmem_to_hbm [thread:$0]  %s137_s6, 128, %s285_s3, [#allocation3]  }
 0x122   :  { %215 = dma.done.wait [#allocation3], 128  }
 0x123   :  { %216 = vsyncadd [#allocation3], 4294967168 }
 0x124   :  { %143 = vsyncpa [#allocation3], 1 }

</bundles_post_ra>
